<compile_context>
chip_gen: v7x
topology: tpu7x:2x2x1
jax: 0.10.0
libtpu: 0.0.40
codegen_flags: <defaults>
</compile_context>

<pallas_src>
import jax
import jax.numpy as jnp
from jax.experimental import pallas as pl
from jax.experimental.pallas import tpu as pltpu


def _round_up(x, m):
    return ((x + m - 1) // m) * m


def _encoder_kernel(x_ref, hi_ref, lo_ref, out_ref):
    # x_ref  : (TN, F)          int32     -- indices for this row tile
    # hi_ref : (F, V, H_pad)    bfloat16  -- high half of the f32 tables
    # lo_ref : (F, V, H_pad)    bfloat16  -- low  half of the f32 tables
    # out_ref: (TN, H_pad)      float32   -- lane-dense output tile
    tn, f = x_ref.shape
    _, v, h_pad = hi_ref.shape

    idx = x_ref[...]                                          # (TN, F)
    lane = jax.lax.broadcasted_iota(jnp.int32, (tn, v), 1)    # (TN, V)

    acc = jnp.zeros((tn, h_pad), jnp.float32)
    # Static Python loop over features (F is small); each iteration is a
    # VPU compare -> two bf16 MXU dots accumulated in f32.
    for i in range(f):
        onehot = (lane == idx[:, i:i + 1]).astype(jnp.bfloat16)   # exact 0/1
        acc = acc + jnp.dot(onehot, hi_ref[i],
                            preferred_element_type=jnp.float32)
        acc = acc + jnp.dot(onehot, lo_ref[i],
                            preferred_element_type=jnp.float32)
    out_ref[...] = acc


def prepare_tables(emb_tables, num_features=None):
    """One-time (hoisted) table prep.

    emb_tables: (F_tab, V, H) float32 stack of nn.Embedding weights.
    Returns (hi, lo): bfloat16 tables of shape (F, V_pad, H_pad) with
    V_pad, H_pad multiples of 128 and  f32(hi) + f32(lo) ~= w  (error <= 2^-16 |w|).
    """
    if num_features is not None:
        emb_tables = emb_tables[:num_features]
    f, v, h = emb_tables.shape
    v_pad = _round_up(v, 128)
    h_pad = _round_up(h, 128)
    w = jnp.pad(emb_tables.astype(jnp.float32),
                ((0, 0), (0, v_pad - v), (0, h_pad - h)))
    hi = w.astype(jnp.bfloat16)
    lo = (w - hi.astype(jnp.float32)).astype(jnp.bfloat16)
    return hi, lo


def discrete_encoder(x, tables_hi, tables_lo, hidden_channels):
    """x: (N,) or (N, F) int indices; tables_*: (F, V_pad, H_pad) bfloat16.

    Returns (N, hidden_channels) float32 = sum_f emb[f][x[:, f]].
    Note: out-of-range / negative indices contribute zero (no one-hot match)
    instead of raising like nn.Embedding.
    """
    if x.ndim == 1:
        x = x[:, None]
    n, f = x.shape
    f_tab, v, h_pad = tables_hi.shape
    assert f == f_tab, "prepare_tables must be called with num_features == x.shape[1]"
    assert tables_lo.shape == tables_hi.shape
    assert hidden_channels <= h_pad

    # Row tile: sublane-aligned (multiple of 16 for bf16 packing), capped at 512.
    tn = min(512, _round_up(max(n, 1), 16))
    n_pad = _round_up(n, tn)
    # Padded rows use index 0 (read real weights) and are sliced off below.
    x_p = jnp.pad(x.astype(jnp.int32), ((0, n_pad - n), (0, 0)))

    out = pl.pallas_call(
        _encoder_kernel,
        out_shape=jax.ShapeDtypeStruct((n_pad, h_pad), jnp.float32),
        grid_spec=pltpu.PrefetchScalarGridSpec(
            num_scalar_prefetch=0,
            grid=(n_pad // tn,),
            in_specs=[
                pl.BlockSpec((tn, f), lambda i: (i, 0)),
                pl.BlockSpec((f, v, h_pad), lambda i: (0, 0, 0)),
                pl.BlockSpec((f, v, h_pad), lambda i: (0, 0, 0)),
            ],
            out_specs=pl.BlockSpec((tn, h_pad), lambda i: (i, 0)),
        ),
        compiler_params=pltpu.CompilerParams(
            dimension_semantics=("parallel",)),
    )(x_p, tables_hi, tables_lo)

    return out[:n, :hidden_channels]


if __name__ == "__main__":
    # Module hyper-parameters (consistent with the PyTorch __init__).
    hidden_channels = 32
    max_num_features = 10
    max_num_values = 500

    # Problem size: N samples, F discrete features actually present in x.
    N, F = 16, 4

    key = jax.random.PRNGKey(0)
    k_w, k_x = jax.random.split(key)

    # Deterministic nn.Embedding-style init: weight ~ N(0, 1).
    emb_full = jax.random.normal(
        k_w, (max_num_features, max_num_values, hidden_channels), jnp.float32)

    x = jax.random.randint(k_x, (N, F), 0, max_num_values, dtype=jnp.int32)

    # --- one-time table prep (hoisted out of the per-call wrapper) ---
    tables_hi, tables_lo = prepare_tables(emb_full, num_features=F)

    out = discrete_encoder(x, tables_hi, tables_lo, hidden_channels)
    out = jax.block_until_ready(out)
    assert out.shape == (N, hidden_channels)

    # Mechanical check: kernel output must equal an exact f32 gather of the
    # hi/lo-split tables (the one-hot matmul is an exact row selection).
    split = tables_hi.astype(jnp.float32) + tables_lo.astype(jnp.float32)
    ref_split = jnp.zeros((N, hidden_channels), jnp.float32)
    for i in range(F):
        ref_split = ref_split + split[i][x[:, i], :hidden_channels]
    assert jnp.allclose(out, ref_split, atol=1e-5, rtol=1e-5), \
        "kernel mismatch vs exact gather of split tables"

    # End-to-end check vs the pure-f32 reference.  The bf16 hi/lo split bounds
    # the per-element error by F * 2^-16 * |w| (typically ~1e-5 for N(0,1)
    # weights), so 1e-4 tolerances hold with huge margin.
    ref = jnp.zeros((N, hidden_channels), jnp.float32)
    for i in range(F):
        ref = ref + emb_full[i][x[:, i]]
    assert jnp.allclose(out, ref, atol=1e-4, rtol=1e-4), "mismatch vs f32 reference"

    # Also exercise the 1-D input path (PyTorch's x.dim() == 1 branch).
    hi1, lo1 = prepare_tables(emb_full, num_features=1)
    out1 = discrete_encoder(x[:, 0], hi1, lo1, hidden_channels)
    out1 = jax.block_until_ready(out1)
    ref1 = emb_full[0][x[:, 0]]
    assert out1.shape == (N, hidden_channels)
    assert jnp.allclose(out1, ref1, atol=1e-4, rtol=1e-4), "1-D path mismatch"

    print("KERNEL_OK")
</pallas_src>

<mosaic_0001>
module attributes {stable_mosaic.version = 11 : i64} {
  func.func @_encoder_kernel(%arg0: i32, %arg1: memref<16x4xi32, #tpu.memory_space<vmem>>, %arg2: memref<4x512x128xbf16, #tpu.memory_space<vmem>>, %arg3: memref<4x512x128xbf16, #tpu.memory_space<vmem>>, %arg4: memref<16x128xf32, #tpu.memory_space<vmem>>) attributes {dimension_semantics = [#tpu.dimension_semantics<parallel>], iteration_bounds = array<i64: 1>, scalar_prefetch = 0 : i64, scratch_operands = 0 : i64, tpu.core_type = #tpu.core_type<tc>, window_params = [{transform_indices = @transform_0, window_bounds = array<i64: 16, 4>}, {pipeline_mode = #tpu.pipeline_mode<synchronous>, transform_indices = @transform_1, window_bounds = array<i64: 4, 512, 128>}, {pipeline_mode = #tpu.pipeline_mode<synchronous>, transform_indices = @transform_2, window_bounds = array<i64: 4, 512, 128>}, {transform_indices = @transform_3, window_bounds = array<i64: 16, 128>}]} {
    %c0 = arith.constant 0 : index
    %c0_0 = arith.constant 0 : index
    %0 = vector.load %arg1[%c0, %c0_0] : memref<16x4xi32, #tpu.memory_space<vmem>>, vector<16x4xi32>
    %1 = tpu.iota {dimensions = array<i32: 1>} : vector<16x512xi32>
    %cst = arith.constant 0.000000e+00 : f32
    %2 = vector.broadcast %cst : f32 to vector<16x128xf32>
    %3 = vector.extract_strided_slice %0 {offsets = [0, 0], sizes = [16, 1], strides = [1, 1]} : vector<16x4xi32> to vector<16x1xi32>
    %4 = vector.broadcast %3 : vector<16x1xi32> to vector<16x512xi32>
    %5 = arith.cmpi eq, %1, %4 : vector<16x512xi32>
    %6 = arith.extui %5 : vector<16x512xi1> to vector<16x512xi32>
    %7 = arith.sitofp %6 : vector<16x512xi32> to vector<16x512xf32>
    %8 = arith.truncf %7 : vector<16x512xf32> to vector<16x512xbf16>
    %c0_1 = arith.constant 0 : index
    %c0_2 = arith.constant 0 : index
    %c0_3 = arith.constant 0 : index
    %9 = vector.load %arg2[%c0_1, %c0_2, %c0_3] : memref<4x512x128xbf16, #tpu.memory_space<vmem>>, vector<1x512x128xbf16>
    %10 = vector.shape_cast %9 : vector<1x512x128xbf16> to vector<512x128xbf16>
    %cst_4 = arith.constant dense<0.000000e+00> : vector<16x128xf32>
    %11 = tpu.matmul %8, %10, %cst_4 {dimension_numbers = #tpu.dot_dimension_numbers<[1], [0], [0], [1], [0, 0, 1, 1], [], []>} : vector<16x512xbf16>, vector<512x128xbf16>, vector<16x128xf32> -> vector<16x128xf32>
    %12 = arith.addf %2, %11 : vector<16x128xf32>
    %c0_5 = arith.constant 0 : index
    %c0_6 = arith.constant 0 : index
    %c0_7 = arith.constant 0 : index
    %13 = vector.load %arg3[%c0_5, %c0_6, %c0_7] : memref<4x512x128xbf16, #tpu.memory_space<vmem>>, vector<1x512x128xbf16>
    %14 = vector.shape_cast %13 : vector<1x512x128xbf16> to vector<512x128xbf16>
    %cst_8 = arith.constant dense<0.000000e+00> : vector<16x128xf32>
    %15 = tpu.matmul %8, %14, %cst_8 {dimension_numbers = #tpu.dot_dimension_numbers<[1], [0], [0], [1], [0, 0, 1, 1], [], []>} : vector<16x512xbf16>, vector<512x128xbf16>, vector<16x128xf32> -> vector<16x128xf32>
    %16 = arith.addf %12, %15 : vector<16x128xf32>
    %17 = vector.extract_strided_slice %0 {offsets = [0, 1], sizes = [16, 1], strides = [1, 1]} : vector<16x4xi32> to vector<16x1xi32>
    %18 = vector.broadcast %17 : vector<16x1xi32> to vector<16x512xi32>
    %19 = arith.cmpi eq, %1, %18 : vector<16x512xi32>
    %20 = arith.extui %19 : vector<16x512xi1> to vector<16x512xi32>
    %21 = arith.sitofp %20 : vector<16x512xi32> to vector<16x512xf32>
    %22 = arith.truncf %21 : vector<16x512xf32> to vector<16x512xbf16>
    %c1 = arith.constant 1 : index
    %c0_9 = arith.constant 0 : index
    %c0_10 = arith.constant 0 : index
    %23 = vector.load %arg2[%c1, %c0_9, %c0_10] : memref<4x512x128xbf16, #tpu.memory_space<vmem>>, vector<1x512x128xbf16>
    %24 = vector.shape_cast %23 : vector<1x512x128xbf16> to vector<512x128xbf16>
    %cst_11 = arith.constant dense<0.000000e+00> : vector<16x128xf32>
    %25 = tpu.matmul %22, %24, %cst_11 {dimension_numbers = #tpu.dot_dimension_numbers<[1], [0], [0], [1], [0, 0, 1, 1], [], []>} : vector<16x512xbf16>, vector<512x128xbf16>, vector<16x128xf32> -> vector<16x128xf32>
    %26 = arith.addf %16, %25 : vector<16x128xf32>
    %c1_12 = arith.constant 1 : index
    %c0_13 = arith.constant 0 : index
    %c0_14 = arith.constant 0 : index
    %27 = vector.load %arg3[%c1_12, %c0_13, %c0_14] : memref<4x512x128xbf16, #tpu.memory_space<vmem>>, vector<1x512x128xbf16>
    %28 = vector.shape_cast %27 : vector<1x512x128xbf16> to vector<512x128xbf16>
    %cst_15 = arith.constant dense<0.000000e+00> : vector<16x128xf32>
    %29 = tpu.matmul %22, %28, %cst_15 {dimension_numbers = #tpu.dot_dimension_numbers<[1], [0], [0], [1], [0, 0, 1, 1], [], []>} : vector<16x512xbf16>, vector<512x128xbf16>, vector<16x128xf32> -> vector<16x128xf32>
    %30 = arith.addf %26, %29 : vector<16x128xf32>
    %31 = vector.extract_strided_slice %0 {offsets = [0, 2], sizes = [16, 1], strides = [1, 1]} : vector<16x4xi32> to vector<16x1xi32>
    %32 = vector.broadcast %31 : vector<16x1xi32> to vector<16x512xi32>
    %33 = arith.cmpi eq, %1, %32 : vector<16x512xi32>
    %34 = arith.extui %33 : vector<16x512xi1> to vector<16x512xi32>
    %35 = arith.sitofp %34 : vector<16x512xi32> to vector<16x512xf32>
    %36 = arith.truncf %35 : vector<16x512xf32> to vector<16x512xbf16>
    %c2 = arith.constant 2 : index
    %c0_16 = arith.constant 0 : index
    %c0_17 = arith.constant 0 : index
    %37 = vector.load %arg2[%c2, %c0_16, %c0_17] : memref<4x512x128xbf16, #tpu.memory_space<vmem>>, vector<1x512x128xbf16>
    %38 = vector.shape_cast %37 : vector<1x512x128xbf16> to vector<512x128xbf16>
    %cst_18 = arith.constant dense<0.000000e+00> : vector<16x128xf32>
    %39 = tpu.matmul %36, %38, %cst_18 {dimension_numbers = #tpu.dot_dimension_numbers<[1], [0], [0], [1], [0, 0, 1, 1], [], []>} : vector<16x512xbf16>, vector<512x128xbf16>, vector<16x128xf32> -> vector<16x128xf32>
    %40 = arith.addf %30, %39 : vector<16x128xf32>
    %c2_19 = arith.constant 2 : index
    %c0_20 = arith.constant 0 : index
    %c0_21 = arith.constant 0 : index
    %41 = vector.load %arg3[%c2_19, %c0_20, %c0_21] : memref<4x512x128xbf16, #tpu.memory_space<vmem>>, vector<1x512x128xbf16>
    %42 = vector.shape_cast %41 : vector<1x512x128xbf16> to vector<512x128xbf16>
    %cst_22 = arith.constant dense<0.000000e+00> : vector<16x128xf32>
    %43 = tpu.matmul %36, %42, %cst_22 {dimension_numbers = #tpu.dot_dimension_numbers<[1], [0], [0], [1], [0, 0, 1, 1], [], []>} : vector<16x512xbf16>, vector<512x128xbf16>, vector<16x128xf32> -> vector<16x128xf32>
    %44 = arith.addf %40, %43 : vector<16x128xf32>
    %45 = vector.extract_strided_slice %0 {offsets = [0, 3], sizes = [16, 1], strides = [1, 1]} : vector<16x4xi32> to vector<16x1xi32>
    %46 = vector.broadcast %45 : vector<16x1xi32> to vector<16x512xi32>
    %47 = arith.cmpi eq, %1, %46 : vector<16x512xi32>
    %48 = arith.extui %47 : vector<16x512xi1> to vector<16x512xi32>
    %49 = arith.sitofp %48 : vector<16x512xi32> to vector<16x512xf32>
    %50 = arith.truncf %49 : vector<16x512xf32> to vector<16x512xbf16>
    %c3 = arith.constant 3 : index
    %c0_23 = arith.constant 0 : index
    %c0_24 = arith.constant 0 : index
    %51 = vector.load %arg2[%c3, %c0_23, %c0_24] : memref<4x512x128xbf16, #tpu.memory_space<vmem>>, vector<1x512x128xbf16>
    %52 = vector.shape_cast %51 : vector<1x512x128xbf16> to vector<512x128xbf16>
    %cst_25 = arith.constant dense<0.000000e+00> : vector<16x128xf32>
    %53 = tpu.matmul %50, %52, %cst_25 {dimension_numbers = #tpu.dot_dimension_numbers<[1], [0], [0], [1], [0, 0, 1, 1], [], []>} : vector<16x512xbf16>, vector<512x128xbf16>, vector<16x128xf32> -> vector<16x128xf32>
    %54 = arith.addf %44, %53 : vector<16x128xf32>
    %c3_26 = arith.constant 3 : index
    %c0_27 = arith.constant 0 : index
    %c0_28 = arith.constant 0 : index
    %55 = vector.load %arg3[%c3_26, %c0_27, %c0_28] : memref<4x512x128xbf16, #tpu.memory_space<vmem>>, vector<1x512x128xbf16>
    %56 = vector.shape_cast %55 : vector<1x512x128xbf16> to vector<512x128xbf16>
    %cst_29 = arith.constant dense<0.000000e+00> : vector<16x128xf32>
    %57 = tpu.matmul %50, %56, %cst_29 {dimension_numbers = #tpu.dot_dimension_numbers<[1], [0], [0], [1], [0, 0, 1, 1], [], []>} : vector<16x512xbf16>, vector<512x128xbf16>, vector<16x128xf32> -> vector<16x128xf32>
    %58 = arith.addf %54, %57 : vector<16x128xf32>
    %c0_30 = arith.constant 0 : index
    %c0_31 = arith.constant 0 : index
    %59 = vector.load %arg4[%c0_30, %c0_31] : memref<16x128xf32, #tpu.memory_space<vmem>>, vector<16x128xf32>
    tpu.vector_store %arg4[%c0_30, %c0_31], %58 {strides = array<i32>} : memref<16x128xf32, #tpu.memory_space<vmem>>, vector<16x128xf32>,
    return
  }
  func.func @transform_0(%arg0: i32) -> (i32, i32) {
    %c0_i32 = arith.constant 0 : i32
    %c0_i32_0 = arith.constant 0 : i32
    return %arg0, %c0_i32 : i32, i32
  }
  func.func @transform_1(%arg0: i32) -> (i32, i32, i32) {
    %c0_i32 = arith.constant 0 : i32
    %c0_i32_0 = arith.constant 0 : i32
    %c0_i32_1 = arith.constant 0 : i32
    %c0_i32_2 = arith.constant 0 : i32
    return %c0_i32, %c0_i32_0, %c0_i32_1 : i32, i32, i32
  }
  func.func @transform_2(%arg0: i32) -> (i32, i32, i32) {
    %c0_i32 = arith.constant 0 : i32
    %c0_i32_0 = arith.constant 0 : i32
    %c0_i32_1 = arith.constant 0 : i32
    %c0_i32_2 = arith.constant 0 : i32
    return %c0_i32, %c0_i32_0, %c0_i32_1 : i32, i32, i32
  }
  func.func @transform_3(%arg0: i32) -> (i32, i32) {
    %c0_i32 = arith.constant 0 : i32
    %c0_i32_0 = arith.constant 0 : i32
    return %arg0, %c0_i32 : i32, i32
  }
}

</mosaic_0001>

<bundles_post_ra>
// kernel: tpu_custom_call.1
= control target key start
LH: loop header
LB: loop body
LE: loop exit
PB: predicated region body
PF: predicated region fallthrough
CT: control target
= control target key end

     0   :  { %8 = vsyncpa [#allocation3], 0  ;;  %s4304_s0 = inlined_call_operand.vmem [shape: s32[16,4], index: 0, kind: input, shape index: {}]   ;;  %s4305_s1 = inlined_call_operand.hbm [shape: bf16[4,512,128], index: 1, kind: input, shape index: {}]   ;;  %s4306_s2 = inlined_call_operand.hbm [shape: bf16[4,512,128], index: 2, kind: input, shape index: {}]   ;;  %s4307_s3 = inlined_call_operand.hbm [shape: f32[16,128], index: 3, kind: output, shape index: {}]  }
   0x1   :  { %9 = vsyncpa [#allocation6], 0 }
   0x2   :  { %10 = vsyncpa [#allocation4], 0  ;;  %s3979_s12 = smov [#allocation2]   ;;  %s3907_s16 = scalar_lea.hbm %s4305_s1, 16384 }
   0x3   :  { %s18_s13 = sshll.u32 %s3979_s12, 4  ;;  %p3908_p0 = scmp.ne.s32.totalorder %s4305_s1, %s3907_s16  ;;  %s19_s13 = int_to_ptr.vmem [resolvable:$true] %s18_s13 }
   0x4   :  { %p3911_p1 = scmp.lt.u32.totalorder %s3907_s16, %s4305_s1 }
   0x6   :  { %p3913_p2 = pnand %p3911_p1, %p3908_p0 }
   0x8   :  { %3916 = shalt.err (!%p3913_p2)
}
   0x9   :  { %s3917_s21 = scalar_lea.vmem %s19_s13, 16384  ;;  %p3922_p4 = scmp.lt.s32.totalorder %s19_s13, %s19_s13 }
   0xa   :  { %p3918_p3 = scmp.ne.s32.totalorder %s19_s13, %s3917_s21  ;;  %p3923_p5 = scmp.lt.s32.totalorder %s3917_s21, %s3917_s21 }
   0xc   :  { %p3924_p6 = por %p3923_p5, %p3922_p4 }
   0xe   :  { %p3925_p7 = pnand %p3924_p6, %p3918_p3 }
  0x10   :  { %3928 = shalt.err (!%p3925_p7)
}
  0x11   :  { %s3980_s22 = smov 64   ;;  %s3981_s23 = smov 4  }
  0x12   :  { %24 = dma.hbm_to_vmem [thread:$0]  %s4305_s1, 16384, %s19_s13, [#allocation3], %s3980_s22, %s3980_s22, %s3981_s23  }
  0x13   :  { %s3982_s26 = smov [#allocation5]   ;;  %s3929_s30 = scalar_lea.hbm %s4306_s2, 16384 }
  0x14   :  { %s30_s27 = sshll.u32 %s3982_s26, 4  ;;  %p3930_p8 = scmp.ne.s32.totalorder %s4306_s2, %s3929_s30  ;;  %s31_s27 = int_to_ptr.vmem [resolvable:$true] %s30_s27 }
  0x15   :  { %p3933_p9 = scmp.lt.u32.totalorder %s3929_s30, %s4306_s2 }
  0x17   :  { %p3935_p10 = pnand %p3933_p9, %p3930_p8 }
  0x19   :  { %3938 = shalt.err (!%p3935_p10)
}
  0x1a   :  { %s3939_s8 = scalar_lea.vmem %s31_s27, 16384  ;;  %p3944_p12 = scmp.lt.s32.totalorder %s31_s27, %s31_s27 }
  0x1b   :  { %p3940_p11 = scmp.ne.s32.totalorder %s31_s27, %s3939_s8  ;;  %p3945_p13 = scmp.lt.s32.totalorder %s3939_s8, %s3939_s8 }
  0x1d   :  { %p3946_p0 = por %p3945_p13, %p3944_p12 }
  0x1f   :  { %p3947_p1 = pnand %p3946_p0, %p3940_p11 }
  0x21   :  { %3950 = shalt.err (!%p3947_p1)
}
  0x22   :  { %36 = dma.hbm_to_vmem [thread:$0]  %s4306_s2, 16384, %s31_s27, [#allocation6], %s3980_s22, %s3980_s22, %s3981_s23  }
  0x23   :  { %3973 = dma.done.wait [#allocation3], 16384  }
  0x24   :  { %3974 = vsyncadd [#allocation3], 4294950912 }
  0x25   :  { %3975 = dma.done.wait [#allocation6], 16384  }
  0x26   :  { %3976 = vsyncadd [#allocation6], 4294950912  ;;  %v3983_v0 = vmov 0   ;;  %v3984_v1 = vmov 1   ;;  %v4038_v2 = vld [vmem:[%s4304_s0] sm:$0xff]  ;;  %v4043_v3 = vld [vmem:[%s4304_s0 + $0x8] sm:$0xff]  ;;  %v46_v40 = vlaneseq }
  0x27   :  { %3645 = vset.pattern.permute.xlu0 %v3983_v0  ;;  %3646 = vset.pattern.permute.xlu1 %v3984_v1  ;;  %v3651_v4 = vld [vmem:[#allocation5 + $0x40] sm:$0xff]   ;;  %v3655_v8 = vld [vmem:[#allocation5 + $0x48] sm:$0xff]   ;;  %v3659_v12 = vld [vmem:[#allocation5 + $0x50] sm:$0xff]   ;;  %v3985_v13 = vmov 2   ;;  %v3986_v39 = vmov 3   ;;  %s3988_s0 = smov [#allocation7]  }
  0x28   :  { %52 = vperm.xlu0 %3645, %v4038_v2   ;;  %762 = vperm.xlu1 %3646, %v4038_v2   ;;  %v3652_v5 = vld [vmem:[#allocation5 + $0xc0] sm:$0xff]   ;;  %v3656_v9 = vld [vmem:[#allocation5 + $0xc8] sm:$0xff]   ;;  %v3660_v14 = vld [vmem:[#allocation5 + $0xd0] sm:$0xff]   ;;  %v4053_v41 = vand.u32 127, %v46_v40  ;;  %v3987_v50 = vmov 1.0|1.0  }
  0x29   :  { %3281 = vmatprep.subr.bf16.mxu0 %v3651_v4  ;;  %v3653_v6 = vld [vmem:[#allocation5] sm:$0xff]   ;;  %3303 = vmatprep.subr.bf16.mxu1 %v3652_v5  ;;  %v3657_v10 = vld [vmem:[#allocation5 + $0x8] sm:$0xff]   ;;  %v3661_v15 = vld [vmem:[#allocation5 + $0x10] sm:$0xff]   ;;  %s2916_s2 = sshll.u32 %s3988_s0, 4  ;;  %s2917_s2 = int_to_ptr.vmem [resolvable:$true] %s2916_s2 }
  0x2a   :  { %v3654_v7 = vld [vmem:[#allocation5 + $0x80] sm:$0xff]   ;;  %3282 = vmatpush3.bf16.msra.mxu0 %v3653_v6  ;;  %v3658_v11 = vld [vmem:[#allocation5 + $0x88] sm:$0xff]   ;;  %v3662_v16 = vld [vmem:[#allocation5 + $0x90] sm:$0xff]   ;;  %v4056_v43 = vadd.s32 128, %v4053_v41  ;;  %v4059_v44 = vadd.s32 384, %v4053_v41  ;;  %v4062_v45 = vadd.s32 256, %v4053_v41  ;;  %p3956_p3 = scmp.lt.s32.totalorder %s2917_s2, %s2917_s2 }
  0x2b   :  { %3304 = vmatpush3.bf16.msra.mxu1 %v3654_v7  ;;  %3283 = vmatprep.subr.bf16.mxu0 %v3655_v8  ;;  %v3663_v17 = vld [vmem:[#allocation5 + $0x58] sm:$0xff]   ;;  %v3667_v21 = vld [vmem:[#allocation5 + $0x60] sm:$0xff]   ;;  %v3671_v25 = vld [vmem:[#allocation5 + $0x68] sm:$0xff]   ;;  %s3951_s14 = scalar_lea.vmem %s2917_s2, 256 }
  0x2c   :  { %55 = vperm.xlu0 %3645, %v4043_v3   ;;  %765 = vperm.xlu1 %3646, %v4043_v3   ;;  %v3664_v18 = vld [vmem:[#allocation5 + $0xd8] sm:$0xff]   ;;  %v3668_v22 = vld [vmem:[#allocation5 + $0xe0] sm:$0xff]   ;;  %v3672_v26 = vld [vmem:[#allocation5 + $0xe8] sm:$0xff]   ;;  %p3952_p2 = scmp.ne.s32.totalorder %s2917_s2, %s3951_s14  ;;  %p3957_p4 = scmp.lt.s32.totalorder %s3951_s14, %s3951_s14 }
  0x2d   :  { %3305 = vmatprep.subr.bf16.mxu1 %v3656_v9  ;;  %v3665_v19 = vld [vmem:[#allocation5 + $0x18] sm:$0xff]   ;;  %v3669_v23 = vld [vmem:[#allocation5 + $0x20] sm:$0xff]   ;;  %v3673_v27 = vld [vmem:[#allocation5 + $0x28] sm:$0xff]  }
  0x2e   :  { %3284 = vmatpush3.bf16.msra.mxu0 %v3657_v10  ;;  %v3666_v20 = vld [vmem:[#allocation5 + $0x98] sm:$0xff]   ;;  %v3670_v24 = vld [vmem:[#allocation5 + $0xa0] sm:$0xff]   ;;  %v3674_v28 = vld [vmem:[#allocation5 + $0xa8] sm:$0xff]   ;;  %p3958_p5 = por %p3957_p4, %p3956_p3 }
  0x2f   :  { %3306 = vmatpush3.bf16.msra.mxu1 %v3658_v11  ;;  %3285 = vmatprep.subr.bf16.mxu0 %v3659_v12  ;;  %v3675_v29 = vld [vmem:[#allocation5 + $0x70] sm:$0xff]   ;;  %v3679_v33 = vld [vmem:[#allocation5 + $0x78] sm:$0xff]   ;;  %v3683_v37 = vld [vmem:[#allocation2 + $0x40] sm:$0xff]  }
  0x30   :  { %3648 = vset.pattern.permute.xlu1 %v3985_v13  ;;  %3647 = vset.pattern.permute.xlu0 %v3985_v13  ;;  %v3676_v30 = vld [vmem:[#allocation5 + $0xf0] sm:$0xff]   ;;  %v3680_v34 = vld [vmem:[#allocation5 + $0xf8] sm:$0xff]   ;;  %v3684_v38 = vld [vmem:[#allocation2 + $0xc0] sm:$0xff]   ;;  %p3959_p6 = pnand %p3958_p5, %p3952_p2 }
  0x31   :  { %1481 = vperm.xlu1 %3648, %v4043_v3   ;;  %3307 = vmatprep.subr.bf16.mxu1 %v3660_v14  ;;  %v3677_v31 = vld [vmem:[#allocation5 + $0x30] sm:$0xff]   ;;  %v3681_v35 = vld [vmem:[#allocation5 + $0x38] sm:$0xff]   ;;  %v3685_v47 = vld [vmem:[#allocation2] sm:$0xff]  }
  0x32   :  { %1478 = vperm.xlu0 %3647, %v4038_v2   ;;  %3286 = vmatpush3.bf16.msra.mxu0 %v3661_v15  ;;  %v3678_v32 = vld [vmem:[#allocation5 + $0xb0] sm:$0xff]   ;;  %v3682_v36 = vld [vmem:[#allocation5 + $0xb8] sm:$0xff]   ;;  %v3686_v49 = vld [vmem:[#allocation2 + $0x80] sm:$0xff]  }
  0x33   :  { %3308 = vmatpush3.bf16.msra.mxu1 %v3662_v16  ;;  %3287 = vmatprep.subr.bf16.mxu0 %v3663_v17  ;;  %v3687_v53 = vld [vmem:[#allocation2 + $0x48] sm:$0xff]   ;;  %v3691_v58 = vld [vmem:[#allocation2 + $0x50] sm:$0xff]   ;;  %v3695_v62 = vld [vmem:[#allocation2 + $0x58] sm:$0xff]  }
  0x34   :  { %3309 = vmatprep.subr.bf16.mxu1 %v3664_v18  ;;  %v3688_v55 = vld [vmem:[#allocation2 + $0xc8] sm:$0xff]   ;;  %v3692_v59 = vld [vmem:[#allocation2 + $0xd0] sm:$0xff]   ;;  %v3696_v63 = vld [vmem:[#allocation2 + $0xd8] sm:$0xff]  }
  0x35   :  { %3649 = vset.pattern.permute.xlu1 %v3986_v39  ;;  %v3689_v56 = vld [vmem:[#allocation2 + $0x8] sm:$0xff]   ;;  %v3693_v60 = vld [vmem:[#allocation2 + $0x10] sm:$0xff]   ;;  %v3697_v0 = vld [vmem:[#allocation2 + $0x18] sm:$0xff]  }
  0x36   :  { %3288 = vmatpush3.bf16.msra.mxu0 %v3665_v19  ;;  %3650 = vset.pattern.permute.xlu0 %v3986_v39  ;;  %v3690_v57 = vld [vmem:[#allocation2 + $0x88] sm:$0xff]   ;;  %v3694_v61 = vld [vmem:[#allocation2 + $0x90] sm:$0xff]   ;;  %v3698_v1 = vld [vmem:[#allocation2 + $0x98] sm:$0xff]  }
  0x37   :  { %3310 = vmatpush3.bf16.msra.mxu1 %v3666_v20  ;;  %3289 = vmatprep.subr.bf16.mxu0 %v3667_v21  ;;  %v3701_v4 = vld [vmem:[#allocation2 + $0x20] sm:$0xff]   ;;  %v3703_v6 = vld [vmem:[#allocation2 + $0x68] sm:$0xff]   ;;  %v3707_v10 = vld [vmem:[#allocation2 + $0x70] sm:$0xff]  }
  0x38   :  { %3311 = vmatprep.subr.bf16.mxu1 %v3668_v22  ;;  %2194 = vperm.xlu1 %3649, %v4038_v2   ;;  %v3699_v2 = vld [vmem:[#allocation2 + $0x60] sm:$0xff]   ;;  %v3704_v7 = vld [vmem:[#allocation2 + $0xe8] sm:$0xff]   ;;  %v3708_v11 = vld [vmem:[#allocation2 + $0xf0] sm:$0xff]  }
  0x39   :  { %2197 = vperm.xlu0 %3650, %v4043_v3   ;;  %v3700_v3 = vld [vmem:[#allocation2 + $0xe0] sm:$0xff]   ;;  %v3705_v8 = vld [vmem:[#allocation2 + $0x28] sm:$0xff]   ;;  %v3709_v12 = vld [vmem:[#allocation2 + $0x30] sm:$0xff]  }
  0x3a   :  { %3290 = vmatpush3.bf16.msra.mxu0 %v3669_v23  ;;  %v3702_v5 = vld [vmem:[#allocation2 + $0xa0] sm:$0xff]   ;;  %v3706_v9 = vld [vmem:[#allocation2 + $0xa8] sm:$0xff]   ;;  %v3710_v14 = vld [vmem:[#allocation2 + $0xb0] sm:$0xff]  }
  0x3b   :  { %3312 = vmatpush3.bf16.msra.mxu1 %v3670_v24  ;;  %3291 = vmatprep.subr.bf16.mxu0 %v3671_v25  ;;  %v3711_v15 = vld [vmem:[#allocation2 + $0x78] sm:$0xff]   ;;  %v3715_v19 = vld [vmem:[#allocation2 + $0x140] sm:$0xff]   ;;  %v3719_v24 = vld [vmem:[#allocation2 + $0x148] sm:$0xff]  }
  0x3c   :  { %3313 = vmatprep.subr.bf16.mxu1 %v3672_v26  ;;  %v3712_v16 = vld [vmem:[#allocation2 + $0xf8] sm:$0xff]   ;;  %v3716_v21 = vld [vmem:[#allocation2 + $0x1c0] sm:$0xff]   ;;  %v3720_v25 = vld [vmem:[#allocation2 + $0x1c8] sm:$0xff]  }
  0x3d   :  { %v3713_v17 = vld [vmem:[#allocation2 + $0x38] sm:$0xff]   ;;  %v3717_v22 = vld [vmem:[#allocation2 + $0x100] sm:$0xff]   ;;  %v3721_v26 = vld [vmem:[#allocation2 + $0x108] sm:$0xff]  }
  0x3e   :  { %3292 = vmatpush3.bf16.msra.mxu0 %v3673_v27  ;;  %v3714_v18 = vld [vmem:[#allocation2 + $0xb8] sm:$0xff]   ;;  %v3718_v23 = vld [vmem:[#allocation2 + $0x180] sm:$0xff]   ;;  %v3722_v27 = vld [vmem:[#allocation2 + $0x188] sm:$0xff]  }
  0x3f   :  { %3314 = vmatpush3.bf16.msra.mxu1 %v3674_v28  ;;  %3293 = vmatprep.subr.bf16.mxu0 %v3675_v29  ;;  %v3723_v28 = vld [vmem:[#allocation2 + $0x150] sm:$0xff]   ;;  %v3732_v39 = vld [vmem:[#allocation2 + $0x1e0] sm:$0xff]   ;;  %v3737_v48 = vld [vmem:[#allocation2 + $0x128] sm:$0xff]  }
  0x40   :  { %3315 = vmatprep.subr.bf16.mxu1 %v3676_v30  ;;  %v3733_v40 = vld [vmem:[#allocation2 + $0x120] sm:$0xff]   ;;  %v3739_v51 = vld [vmem:[#allocation2 + $0x170] sm:$0xff]  }
  0x41   :  { %v3740_v52 = vld [vmem:[#allocation2 + $0x1f0] sm:$0xff]   ;;  %v3779_v29 = vld [vmem:[#allocation2 + $0x240] sm:$0xff]  }
  0x42   :  { %3294 = vmatpush3.bf16.msra.mxu0 %v3677_v31  ;;  %v3724_v31 = vld [vmem:[#allocation2 + $0x1d0] sm:$0xff]  }
  0x43   :  { %3316 = vmatpush3.bf16.msra.mxu1 %v3678_v32  ;;  %3295 = vmatprep.subr.bf16.mxu0 %v3679_v33  ;;  %v3725_v32 = vld [vmem:[#allocation2 + $0x110] sm:$0xff]  }
  0x44   :  { %3317 = vmatprep.subr.bf16.mxu1 %v3680_v34  ;;  %v3726_v33 = vld [vmem:[#allocation2 + $0x190] sm:$0xff]   ;;  %v3727_v34 = vld [vmem:[#allocation2 + $0x158] sm:$0xff]  }
  0x45   :  { %v3742_v54 = vld [vmem:[#allocation2 + $0x1b0] sm:$0xff]  }
  0x46   :  { %3296 = vmatpush3.bf16.msra.mxu0 %v3681_v35  ;;  %v3728_v35 = vld [vmem:[#allocation2 + $0x1d8] sm:$0xff]  }
  0x47   :  { %3318 = vmatpush3.bf16.msra.mxu1 %v3682_v36  ;;  %3325 = vmatprep.subr.bf16.mxu0 %v3683_v37  ;;  %v3729_v36 = vld [vmem:[#allocation2 + $0x118] sm:$0xff]  }
  0x48   :  { %3347 = vmatprep.subr.bf16.mxu1 %v3684_v38  ;;  %v3730_v37 = vld [vmem:[#allocation2 + $0x198] sm:$0xff]   ;;  %v3731_v38 = vld [vmem:[#allocation2 + $0x160] sm:$0xff]  }
  0xa7   :  { %v53_v42 = vpop.permute.xlu0 %52  ;;  %v4106_v13 = vpop.permute.xlu1 %762 }
  0xa8   :  { %vm58_vm0 = vcmp.eq.s32.totalorder %v4056_v43, %v53_v42  ;;  %vm60_vm5 = vcmp.eq.s32.totalorder %v4059_v44, %v53_v42  ;;  %vm57_vm8 = vcmp.eq.s32.totalorder %v4053_v41, %v53_v42  ;;  %vm59_vm10 = vcmp.eq.s32.totalorder %v4062_v45, %v53_v42  ;;  %v3734_v42 = vld [vmem:[#allocation2 + $0x1a0] sm:$0xff]  }
  0xa9   :  { %vm768_vm12 = vcmp.eq.s32.totalorder %v4056_v43, %v4106_v13  ;;  %vm770_vm14 = vcmp.eq.s32.totalorder %v4059_v44, %v4106_v13 }
  0xab   :  { %v56_v46 = vpop.permute.xlu0 %55  ;;  %v4108_v20 = vpop.permute.xlu1 %765 }
  0xac   :  { %vm62_vm1 = vcmp.eq.s32.totalorder %v4056_v43, %v56_v46  ;;  %vm64_vm2 = vcmp.eq.s32.totalorder %v4059_v44, %v56_v46  ;;  %vm61_vm3 = vcmp.eq.s32.totalorder %v4053_v41, %v56_v46  ;;  %vm63_vm6 = vcmp.eq.s32.totalorder %v4062_v45, %v56_v46  ;;  %v3735_v46 = vld [vmem:[#allocation2 + $0x168] sm:$0xff]  }
  0xad   :  { %vm4068_vm4 = vmpackc.low %vm62_vm1, %vm58_vm0  ;;  %vm772_vm13 = vcmp.eq.s32.totalorder %v4056_v43, %v4108_v20  ;;  %vm774_vm15 = vcmp.eq.s32.totalorder %v4059_v44, %v4108_v20 }
  0xae   :  { %2970 = vmatprep.mubr.msk.bf16.mxu0 %vm4068_vm4, %v3987_v50  ;;  %vm4077_vm7 = vmpackc.low %vm64_vm2, %vm60_vm5  ;;  %vm767_vm2 = vcmp.eq.s32.totalorder %v4053_v41, %v4106_v13  ;;  %vm773_vm5 = vcmp.eq.s32.totalorder %v4062_v45, %v4108_v20 }
  0xaf   :  { %2974 = vmatprep.mubr.msk.bf16.mxu1 %vm4077_vm7, %v3987_v50  ;;  %vm4085_vm9 = vmpackc.low %vm61_vm3, %vm57_vm8  ;;  %vm771_vm3 = vcmp.eq.s32.totalorder %v4053_v41, %v4108_v20  ;;  %v3770_v20 = vld [vmem:[#allocation5 + $0x1a8] sm:$0xff]  }
  0xb0   :  { %2972 = vmatmul.mubr.msk.bf16.vlgmr.msra.gmra.mrb[0].mxu0 %vm4085_vm9, %v3987_v50  ;;  %vm4093_vm11 = vmpackc.low %vm63_vm6, %vm59_vm10  ;;  %v4166_v30 = vpop.permute.xlu1 %1481 }
  0xb1   :  { %2976 = vmatmul.mubr.msk.bf16.vlgmr.msra.gmra.mrb[0].mxu1 %vm4093_vm11, %v3987_v50  ;;  %3326 = vmatpush3.bf16.msra.mxu0 %v3685_v47  ;;  %vm4121_vm0 = vmpackc.low %vm772_vm13, %vm768_vm12  ;;  %v3736_v47 = vld [vmem:[#allocation2 + $0x1e8] sm:$0xff]  }
  0xb2   :  { %3348 = vmatpush3.bf16.msra.mxu1 %v3686_v49  ;;  %3010 = vmatprep.mubr.msk.bf16.mxu0 %vm4068_vm4, %v3987_v50  ;;  %vm4128_vm1 = vmpackc.low %vm774_vm15, %vm770_vm14  ;;  %v3738_v49 = vld [vmem:[#allocation2 + $0x1a8] sm:$0xff]   ;;  %vm769_vm4 = vcmp.eq.s32.totalorder %v4062_v45, %v4106_v13  ;;  %v3763_v13 = vld [vmem:[#allocation5 + $0x160] sm:$0xff]   ;;  %vm1487_vm14 = vcmp.eq.s32.totalorder %v4053_v41, %v4166_v30 }
  0xb3   :  { %3014 = vmatprep.mubr.msk.bf16.mxu1 %vm4077_vm7, %v3987_v50  ;;  %3327 = vmatprep.subr.bf16.mxu0 %v3687_v53  ;;  %v3741_v53 = vld [vmem:[#allocation2 + $0x130] sm:$0xff]   ;;  %vm4146_vm6 = vmpackc.low %vm771_vm3, %vm767_vm2 }
  0xb4   :  { %3349 = vmatprep.subr.bf16.mxu1 %v3688_v55  ;;  %v3743_v55 = vld [vmem:[#allocation2 + $0x178] sm:$0xff]   ;;  %vm4153_vm7 = vmpackc.low %vm773_vm5, %vm769_vm4 }
  0xb5   :  { %3328 = vmatpush3.bf16.msra.mxu0 %v3689_v56  ;;  %v3744_v56 = vld [vmem:[#allocation2 + $0x1f8] sm:$0xff]  }
  0xb6   :  { %3350 = vmatpush3.bf16.msra.mxu1 %v3690_v57  ;;  %3329 = vmatprep.subr.bf16.mxu0 %v3691_v58  ;;  %v3745_v57 = vld [vmem:[#allocation2 + $0x138] sm:$0xff]  }
  0xb7   :  { %3351 = vmatprep.subr.bf16.mxu1 %v3692_v59  ;;  %v3746_v58 = vld [vmem:[#allocation2 + $0x1b8] sm:$0xff]   ;;  %v3747_v59 = vld [vmem:[#allocation5 + $0x140] sm:$0xff]  }
  0xb9   :  { %3330 = vmatpush3.bf16.msra.mxu0 %v3693_v60  ;;  %v3748_v60 = vld [vmem:[#allocation5 + $0x1c0] sm:$0xff]  }
  0xba   :  { %3352 = vmatpush3.bf16.msra.mxu1 %v3694_v61  ;;  %3331 = vmatprep.subr.bf16.mxu0 %v3695_v62  ;;  %v3749_v61 = vld [vmem:[#allocation5 + $0x100] sm:$0xff]  }
  0xbb   :  { %3353 = vmatprep.subr.bf16.mxu1 %v3696_v63  ;;  %v3750_v62 = vld [vmem:[#allocation5 + $0x180] sm:$0xff]   ;;  %v3751_v63 = vld [vmem:[#allocation5 + $0x148] sm:$0xff]  }
  0xbd   :  { %3332 = vmatpush3.bf16.msra.mxu0 %v3697_v0  ;;  %v3752_v0 = vld [vmem:[#allocation5 + $0x1c8] sm:$0xff]  }
  0xbe   :  { %3354 = vmatpush3.bf16.msra.mxu1 %v3698_v1  ;;  %3333 = vmatprep.subr.bf16.mxu0 %v3699_v2  ;;  %v3753_v2 = vld [vmem:[#allocation5 + $0x108] sm:$0xff]   ;;  %v3806_v1 = vld [vmem:[#allocation2 + $0x2b0] sm:$0xff]  }
  0xbf   :  { %3355 = vmatprep.subr.bf16.mxu1 %v3700_v3  ;;  %v3808_v3 = vld [vmem:[#allocation2 + $0x2f8] sm:$0xff]  }
  0xc1   :  { %3334 = vmatpush3.bf16.msra.mxu0 %v3701_v4  ;;  %v3754_v4 = vld [vmem:[#allocation5 + $0x188] sm:$0xff]  }
  0xc2   :  { %3356 = vmatpush3.bf16.msra.mxu1 %v3702_v5  ;;  %3335 = vmatprep.subr.bf16.mxu0 %v3703_v6  ;;  %v3755_v5 = vld [vmem:[#allocation5 + $0x150] sm:$0xff]  }
  0xc3   :  { %3357 = vmatprep.subr.bf16.mxu1 %v3704_v7  ;;  %v3756_v6 = vld [vmem:[#allocation5 + $0x1d0] sm:$0xff]  }
  0xc4   :  { %v3757_v7 = vld [vmem:[#allocation5 + $0x110] sm:$0xff]  }
  0xc5   :  { %3336 = vmatpush3.bf16.msra.mxu0 %v3705_v8  ;;  %v3758_v8 = vld [vmem:[#allocation5 + $0x190] sm:$0xff]  }
  0xc6   :  { %3358 = vmatpush3.bf16.msra.mxu1 %v3706_v9  ;;  %3337 = vmatprep.subr.bf16.mxu0 %v3707_v10  ;;  %v3759_v9 = vld [vmem:[#allocation5 + $0x158] sm:$0xff]  }
  0xc7   :  { %3359 = vmatprep.subr.bf16.mxu1 %v3708_v11  ;;  %v3760_v10 = vld [vmem:[#allocation5 + $0x1d8] sm:$0xff]  }
  0xc8   :  { %v3761_v11 = vld [vmem:[#allocation5 + $0x118] sm:$0xff]  }
  0xc9   :  { %3338 = vmatpush3.bf16.msra.mxu0 %v3709_v12  ;;  %v3762_v12 = vld [vmem:[#allocation5 + $0x198] sm:$0xff]  }
  0xca   :  { %3360 = vmatpush3.bf16.msra.mxu1 %v3710_v14  ;;  %3339 = vmatprep.subr.bf16.mxu0 %v3711_v15  ;;  %v3764_v14 = vld [vmem:[#allocation5 + $0x1e0] sm:$0xff]  }
  0xcb   :  { %3361 = vmatprep.subr.bf16.mxu1 %v3712_v16  ;;  %v3765_v15 = vld [vmem:[#allocation5 + $0x120] sm:$0xff]  }
  0xcc   :  { %v3766_v16 = vld [vmem:[#allocation5 + $0x1a0] sm:$0xff]  }
  0xcd   :  { %3340 = vmatpush3.bf16.msra.mxu0 %v3713_v17  ;;  %v3767_v17 = vld [vmem:[#allocation5 + $0x168] sm:$0xff]  }
  0xce   :  { %3362 = vmatpush3.bf16.msra.mxu1 %v3714_v18  ;;  %3369 = vmatprep.subr.bf16.mxu0 %v3715_v19  ;;  %v3768_v18 = vld [vmem:[#allocation5 + $0x1e8] sm:$0xff]  }
  0xcf   :  { %3391 = vmatprep.subr.bf16.mxu1 %v3716_v21  ;;  %v3769_v19 = vld [vmem:[#allocation5 + $0x128] sm:$0xff]   ;;  %v3771_v21 = vld [vmem:[#allocation5 + $0x170] sm:$0xff]  }
  0xd0   :  { %3012 = vmatmul.mubr.msk.bf16.vlgmr.msra.gmra.mrb[4].mxu0 %vm4085_vm9, %v3987_v50  ;;  %vm1488_vm9 = vcmp.eq.s32.totalorder %v4056_v43, %v4166_v30 }
  0xd1   :  { %3016 = vmatmul.mubr.msk.bf16.vlgmr.msra.gmra.mrb[4].mxu1 %vm4093_vm11, %v3987_v50  ;;  %3370 = vmatpush3.bf16.msra.mxu0 %v3717_v22  ;;  %v3772_v22 = vld [vmem:[#allocation5 + $0x1f0] sm:$0xff]   ;;  %vm1490_vm11 = vcmp.eq.s32.totalorder %v4059_v44, %v4166_v30 }
  0xd2   :  { %3392 = vmatpush3.bf16.msra.mxu1 %v3718_v23  ;;  %3371 = vmatprep.subr.bf16.mxu0 %v3719_v24  ;;  %v3773_v23 = vld [vmem:[#allocation5 + $0x130] sm:$0xff]  }
  0xd3   :  { %3393 = vmatprep.subr.bf16.mxu1 %v3720_v25  ;;  %3058 = vmatprep.mubr.msk.bf16.mxu0 %vm4121_vm0, %v3987_v50  ;;  %v3774_v24 = vld [vmem:[#allocation5 + $0x1b0] sm:$0xff]   ;;  %v3775_v25 = vld [vmem:[#allocation5 + $0x178] sm:$0xff]  }
  0xd4   :  { %3062 = vmatprep.mubr.msk.bf16.mxu1 %vm4128_vm1, %v3987_v50 }
  0xd5   :  { %3372 = vmatpush3.bf16.msra.mxu0 %v3721_v26  ;;  %v3776_v26 = vld [vmem:[#allocation5 + $0x1f8] sm:$0xff]  }
  0xd6   :  { %3394 = vmatpush3.bf16.msra.mxu1 %v3722_v27  ;;  %3373 = vmatprep.subr.bf16.mxu0 %v3723_v28  ;;  %v3777_v27 = vld [vmem:[#allocation5 + $0x138] sm:$0xff]  }
  0xd7   :  { %3395 = vmatprep.subr.bf16.mxu1 %v3724_v31  ;;  %v3778_v28 = vld [vmem:[#allocation5 + $0x1b8] sm:$0xff]   ;;  %v4168_v31 = vpop.permute.xlu0 %1478 }
  0xd8   :  { %vm1484_vm8 = vcmp.eq.s32.totalorder %v4056_v43, %v4168_v31  ;;  %vm1486_vm10 = vcmp.eq.s32.totalorder %v4059_v44, %v4168_v31  ;;  %vm1483_vm15 = vcmp.eq.s32.totalorder %v4053_v41, %v4168_v31 }
  0xd9   :  { %3374 = vmatpush3.bf16.msra.mxu0 %v3725_v32  ;;  %v3780_v32 = vld [vmem:[#allocation2 + $0x2c0] sm:$0xff]   ;;  %vm4181_vm12 = vmpackc.low %vm1488_vm9, %vm1484_vm8 }
  0xda   :  { %3396 = vmatpush3.bf16.msra.mxu1 %v3726_v33  ;;  %3375 = vmatprep.subr.bf16.mxu0 %v3727_v34  ;;  %v3781_v33 = vld [vmem:[#allocation2 + $0x200] sm:$0xff]   ;;  %vm4188_vm13 = vmpackc.low %vm1490_vm11, %vm1486_vm10 }
  0xdb   :  { %3397 = vmatprep.subr.bf16.mxu1 %v3728_v35  ;;  %v3782_v34 = vld [vmem:[#allocation2 + $0x280] sm:$0xff]   ;;  %v3783_v35 = vld [vmem:[#allocation2 + $0x248] sm:$0xff]   ;;  %vm4206_vm2 = vmpackc.low %vm1487_vm14, %vm1483_vm15 }
  0xdd   :  { %3376 = vmatpush3.bf16.msra.mxu0 %v3729_v36  ;;  %v3784_v36 = vld [vmem:[#allocation2 + $0x2c8] sm:$0xff]  }
  0xde   :  { %3398 = vmatpush3.bf16.msra.mxu1 %v3730_v37  ;;  %3377 = vmatprep.subr.bf16.mxu0 %v3731_v38  ;;  %v3785_v37 = vld [vmem:[#allocation2 + $0x208] sm:$0xff]  }
  0xdf   :  { %3399 = vmatprep.subr.bf16.mxu1 %v3732_v39  ;;  %v3786_v38 = vld [vmem:[#allocation2 + $0x288] sm:$0xff]   ;;  %v3842_v39 = vld [vmem:[#allocation5 + $0x2b8] sm:$0xff]  }
  0xe1   :  { %3378 = vmatpush3.bf16.msra.mxu0 %v3733_v40  ;;  %v3843_v40 = vld [vmem:[#allocation2 + $0x340] sm:$0xff]  }
  0xe2   :  { %3400 = vmatpush3.bf16.msra.mxu1 %v3734_v42  ;;  %3379 = vmatprep.subr.bf16.mxu0 %v3735_v46  ;;  %v3787_v42 = vld [vmem:[#allocation2 + $0x250] sm:$0xff]  }
  0xe3   :  { %3401 = vmatprep.subr.bf16.mxu1 %v3736_v47  ;;  %v3788_v46 = vld [vmem:[#allocation2 + $0x2d0] sm:$0xff]  }
  0xe4   :  { %v3789_v47 = vld [vmem:[#allocation2 + $0x210] sm:$0xff]  }
  0xe5   :  { %3380 = vmatpush3.bf16.msra.mxu0 %v3737_v48  ;;  %v3790_v48 = vld [vmem:[#allocation2 + $0x290] sm:$0xff]  }
  0xe6   :  { %3402 = vmatpush3.bf16.msra.mxu1 %v3738_v49  ;;  %3381 = vmatprep.subr.bf16.mxu0 %v3739_v51  ;;  %v3791_v49 = vld [vmem:[#allocation2 + $0x258] sm:$0xff]  }
  0xe7   :  { %3403 = vmatprep.subr.bf16.mxu1 %v3740_v52  ;;  %v3792_v51 = vld [vmem:[#allocation2 + $0x2d8] sm:$0xff]  }
  0xe8   :  { %v3793_v52 = vld [vmem:[#allocation2 + $0x218] sm:$0xff]  }
  0xe9   :  { %3382 = vmatpush3.bf16.msra.mxu0 %v3741_v53  ;;  %v3794_v53 = vld [vmem:[#allocation2 + $0x298] sm:$0xff]  }
  0xea   :  { %3404 = vmatpush3.bf16.msra.mxu1 %v3742_v54  ;;  %3383 = vmatprep.subr.bf16.mxu0 %v3743_v55  ;;  %v3795_v54 = vld [vmem:[#allocation2 + $0x260] sm:$0xff]  }
  0xeb   :  { %3405 = vmatprep.subr.bf16.mxu1 %v3744_v56  ;;  %v3796_v55 = vld [vmem:[#allocation2 + $0x2e0] sm:$0xff]  }
  0xec   :  { %v3797_v56 = vld [vmem:[#allocation2 + $0x220] sm:$0xff]  }
  0xed   :  { %3384 = vmatpush3.bf16.msra.mxu0 %v3745_v57  ;;  %v3798_v57 = vld [vmem:[#allocation2 + $0x2a0] sm:$0xff]  }
  0xee   :  { %3406 = vmatpush3.bf16.msra.mxu1 %v3746_v58  ;;  %3413 = vmatprep.subr.bf16.mxu0 %v3747_v59  ;;  %v3799_v58 = vld [vmem:[#allocation2 + $0x268] sm:$0xff]  }
  0xef   :  { %3435 = vmatprep.subr.bf16.mxu1 %v3748_v60  ;;  %v3800_v59 = vld [vmem:[#allocation2 + $0x2e8] sm:$0xff]  }
  0xf0   :  { %3060 = vmatmul.mubr.msk.bf16.vlgmr.msra.gmra.mrb[8].mxu0 %vm4146_vm6, %v3987_v50  ;;  %v3801_v60 = vld [vmem:[#allocation2 + $0x228] sm:$0xff]  }
  0xf1   :  { %3064 = vmatmul.mubr.msk.bf16.vlgmr.msra.gmra.mrb[8].mxu1 %vm4153_vm7, %v3987_v50  ;;  %3414 = vmatpush3.bf16.msra.mxu0 %v3749_v61  ;;  %v3802_v61 = vld [vmem:[#allocation2 + $0x2a8] sm:$0xff]  }
  0xf2   :  { %3098 = vmatprep.mubr.msk.bf16.mxu0 %vm4121_vm0, %v3987_v50  ;;  %3436 = vmatpush3.bf16.msra.mxu1 %v3750_v62  ;;  %v3803_v62 = vld [vmem:[#allocation2 + $0x270] sm:$0xff]   ;;  %vm1489_vm0 = vcmp.eq.s32.totalorder %v4062_v45, %v4166_v30  ;;  %v3833_v30 = vld [vmem:[#allocation5 + $0x228] sm:$0xff]  }
  0xf3   :  { %3102 = vmatprep.mubr.msk.bf16.mxu1 %vm4128_vm1, %v3987_v50  ;;  %3415 = vmatprep.subr.bf16.mxu0 %v3751_v63  ;;  %v3804_v63 = vld [vmem:[#allocation2 + $0x2f0] sm:$0xff]   ;;  %vm1485_vm1 = vcmp.eq.s32.totalorder %v4062_v45, %v4168_v31  ;;  %v3834_v31 = vld [vmem:[#allocation5 + $0x2a8] sm:$0xff]  }
  0xf4   :  { %3437 = vmatprep.subr.bf16.mxu1 %v3752_v0  ;;  %v3805_v0 = vld [vmem:[#allocation2 + $0x230] sm:$0xff]   ;;  %vm4210_vm3 = vmpackc.low %vm1489_vm0, %vm1485_vm1 }
  0xf5   :  { %3416 = vmatpush3.bf16.msra.mxu0 %v3753_v2  ;;  %v3807_v2 = vld [vmem:[#allocation2 + $0x278] sm:$0xff]  }
  0xf6   :  { %3438 = vmatpush3.bf16.msra.mxu1 %v3754_v4  ;;  %3417 = vmatprep.subr.bf16.mxu0 %v3755_v5  ;;  %v3809_v4 = vld [vmem:[#allocation2 + $0x238] sm:$0xff]  }
  0xf7   :  { %3439 = vmatprep.subr.bf16.mxu1 %v3756_v6  ;;  %v3810_v5 = vld [vmem:[#allocation2 + $0x2b8] sm:$0xff]   ;;  %v3811_v6 = vld [vmem:[#allocation5 + $0x240] sm:$0xff]  }
  0xf9   :  { %3418 = vmatpush3.bf16.msra.mxu0 %v3757_v7  ;;  %v3812_v7 = vld [vmem:[#allocation5 + $0x2c0] sm:$0xff]  }
  0xfa   :  { %3440 = vmatpush3.bf16.msra.mxu1 %v3758_v8  ;;  %3419 = vmatprep.subr.bf16.mxu0 %v3759_v9  ;;  %v3813_v9 = vld [vmem:[#allocation5 + $0x200] sm:$0xff]   ;;  %v3868_v8 = vld [vmem:[#allocation2 + $0x3f0] sm:$0xff]  }
  0xfb   :  { %3441 = vmatprep.subr.bf16.mxu1 %v3760_v10  ;;  %v3870_v10 = vld [vmem:[#allocation2 + $0x3b0] sm:$0xff]  }
  0xfd   :  { %3420 = vmatpush3.bf16.msra.mxu0 %v3761_v11  ;;  %v3814_v11 = vld [vmem:[#allocation5 + $0x280] sm:$0xff]  }
  0xfe   :  { %3442 = vmatpush3.bf16.msra.mxu1 %v3762_v12  ;;  %3421 = vmatprep.subr.bf16.mxu0 %v3763_v13  ;;  %v3815_v12 = vld [vmem:[#allocation5 + $0x248] sm:$0xff]  }
  0xff   :  { %3443 = vmatprep.subr.bf16.mxu1 %v3764_v14  ;;  %v3816_v13 = vld [vmem:[#allocation5 + $0x2c8] sm:$0xff]  }
 0x100   :  { %v3817_v14 = vld [vmem:[#allocation5 + $0x208] sm:$0xff]  }
 0x101   :  { %3422 = vmatpush3.bf16.msra.mxu0 %v3765_v15  ;;  %v3818_v15 = vld [vmem:[#allocation5 + $0x288] sm:$0xff]  }
 0x102   :  { %3444 = vmatpush3.bf16.msra.mxu1 %v3766_v16  ;;  %3423 = vmatprep.subr.bf16.mxu0 %v3767_v17  ;;  %v3819_v16 = vld [vmem:[#allocation5 + $0x250] sm:$0xff]  }
 0x103   :  { %3445 = vmatprep.subr.bf16.mxu1 %v3768_v18  ;;  %v3820_v17 = vld [vmem:[#allocation5 + $0x2d0] sm:$0xff]  }
 0x104   :  { %v3821_v18 = vld [vmem:[#allocation5 + $0x210] sm:$0xff]  }
 0x105   :  { %3424 = vmatpush3.bf16.msra.mxu0 %v3769_v19  ;;  %v3822_v19 = vld [vmem:[#allocation5 + $0x290] sm:$0xff]  }
 0x106   :  { %3446 = vmatpush3.bf16.msra.mxu1 %v3770_v20  ;;  %3425 = vmatprep.subr.bf16.mxu0 %v3771_v21  ;;  %v3823_v20 = vld [vmem:[#allocation5 + $0x258] sm:$0xff]  }
 0x107   :  { %3447 = vmatprep.subr.bf16.mxu1 %v3772_v22  ;;  %v3824_v21 = vld [vmem:[#allocation5 + $0x2d8] sm:$0xff]  }
 0x108   :  { %v3825_v22 = vld [vmem:[#allocation5 + $0x218] sm:$0xff]  }
 0x109   :  { %3426 = vmatpush3.bf16.msra.mxu0 %v3773_v23  ;;  %v3826_v23 = vld [vmem:[#allocation5 + $0x298] sm:$0xff]  }
 0x10a   :  { %3448 = vmatpush3.bf16.msra.mxu1 %v3774_v24  ;;  %3427 = vmatprep.subr.bf16.mxu0 %v3775_v25  ;;  %v3827_v24 = vld [vmem:[#allocation5 + $0x260] sm:$0xff]  }
 0x10b   :  { %3449 = vmatprep.subr.bf16.mxu1 %v3776_v26  ;;  %v3828_v25 = vld [vmem:[#allocation5 + $0x2e0] sm:$0xff]  }
 0x10c   :  { %v3829_v26 = vld [vmem:[#allocation5 + $0x220] sm:$0xff]  }
 0x10d   :  { %3428 = vmatpush3.bf16.msra.mxu0 %v3777_v27  ;;  %v3830_v27 = vld [vmem:[#allocation5 + $0x2a0] sm:$0xff]  }
 0x10e   :  { %3450 = vmatpush3.bf16.msra.mxu1 %v3778_v28  ;;  %3457 = vmatprep.subr.bf16.mxu0 %v3779_v29  ;;  %v3831_v28 = vld [vmem:[#allocation5 + $0x268] sm:$0xff]  }
 0x10f   :  { %3479 = vmatprep.subr.bf16.mxu1 %v3780_v32  ;;  %v3832_v29 = vld [vmem:[#allocation5 + $0x2e8] sm:$0xff]   ;;  %v3835_v32 = vld [vmem:[#allocation5 + $0x270] sm:$0xff]  }
 0x110   :  { %3100 = vmatmul.mubr.msk.bf16.vlgmr.msra.gmra.mrb[12].mxu0 %vm4146_vm6, %v3987_v50 }
 0x111   :  { %3104 = vmatmul.mubr.msk.bf16.vlgmr.msra.gmra.mrb[12].mxu1 %vm4153_vm7, %v3987_v50  ;;  %3458 = vmatpush3.bf16.msra.mxu0 %v3781_v33  ;;  %v3836_v33 = vld [vmem:[#allocation5 + $0x2f0] sm:$0xff]  }
 0x112   :  { %3480 = vmatpush3.bf16.msra.mxu1 %v3782_v34  ;;  %3459 = vmatprep.subr.bf16.mxu0 %v3783_v35  ;;  %v3837_v34 = vld [vmem:[#allocation5 + $0x230] sm:$0xff]  }
 0x113   :  { %3481 = vmatprep.subr.bf16.mxu1 %v3784_v36  ;;  %3146 = vmatprep.mubr.msk.bf16.mxu0 %vm4181_vm12, %v3987_v50  ;;  %v3838_v35 = vld [vmem:[#allocation5 + $0x2b0] sm:$0xff]   ;;  %v3839_v36 = vld [vmem:[#allocation5 + $0x278] sm:$0xff]  }
 0x114   :  { %3150 = vmatprep.mubr.msk.bf16.mxu1 %vm4188_vm13, %v3987_v50 }
 0x115   :  { %3460 = vmatpush3.bf16.msra.mxu0 %v3785_v37  ;;  %v3840_v37 = vld [vmem:[#allocation5 + $0x2f8] sm:$0xff]  }
 0x116   :  { %3482 = vmatpush3.bf16.msra.mxu1 %v3786_v38  ;;  %3461 = vmatprep.subr.bf16.mxu0 %v3787_v42  ;;  %v3841_v38 = vld [vmem:[#allocation5 + $0x238] sm:$0xff]   ;;  %v4226_v42 = vpop.permute.xlu1 %2194 }
 0x117   :  { %3483 = vmatprep.subr.bf16.mxu1 %v3788_v46  ;;  %v4228_v46 = vpop.permute.xlu0 %2197  ;;  %vm2200_vm4 = vcmp.eq.s32.totalorder %v4056_v43, %v4226_v42  ;;  %vm2202_vm6 = vcmp.eq.s32.totalorder %v4059_v44, %v4226_v42  ;;  %vm2199_vm10 = vcmp.eq.s32.totalorder %v4053_v41, %v4226_v42 }
 0x118   :  { %vm2204_vm5 = vcmp.eq.s32.totalorder %v4056_v43, %v4228_v46  ;;  %vm2206_vm7 = vcmp.eq.s32.totalorder %v4059_v44, %v4228_v46  ;;  %v3849_v43 = vld [vmem:[#allocation2 + $0x308] sm:$0xff]   ;;  %vm2203_vm11 = vcmp.eq.s32.totalorder %v4053_v41, %v4228_v46  ;;  %v3878_v41 = vld [vmem:[#allocation5 + $0x380] sm:$0xff]  }
 0x119   :  { %3462 = vmatpush3.bf16.msra.mxu0 %v3789_v47  ;;  %v3844_v47 = vld [vmem:[#allocation2 + $0x3c0] sm:$0xff]   ;;  %vm4241_vm8 = vmpackc.low %vm2204_vm5, %vm2200_vm4  ;;  %v3850_v44 = vld [vmem:[#allocation2 + $0x388] sm:$0xff]  }
 0x11a   :  { %3484 = vmatpush3.bf16.msra.mxu1 %v3790_v48  ;;  %3463 = vmatprep.subr.bf16.mxu0 %v3791_v49  ;;  %v3845_v48 = vld [vmem:[#allocation2 + $0x300] sm:$0xff]   ;;  %vm4248_vm9 = vmpackc.low %vm2206_vm7, %vm2202_vm6 }
 0x11b   :  { %3485 = vmatprep.subr.bf16.mxu1 %v3792_v51  ;;  %v3846_v49 = vld [vmem:[#allocation2 + $0x380] sm:$0xff]   ;;  %v3847_v51 = vld [vmem:[#allocation2 + $0x348] sm:$0xff]   ;;  %vm4266_vm14 = vmpackc.low %vm2203_vm11, %vm2199_vm10 }
 0x11d   :  { %3464 = vmatpush3.bf16.msra.mxu0 %v3793_v52  ;;  %v3848_v52 = vld [vmem:[#allocation2 + $0x3c8] sm:$0xff]  }
 0x11e   :  { %3486 = vmatpush3.bf16.msra.mxu1 %v3794_v53  ;;  %3465 = vmatprep.subr.bf16.mxu0 %v3795_v54 }
 0x11f   :  { %3487 = vmatprep.subr.bf16.mxu1 %v3796_v55  ;;  %v3851_v55 = vld [vmem:[#allocation2 + $0x350] sm:$0xff]  }
 0x121   :  { %3466 = vmatpush3.bf16.msra.mxu0 %v3797_v56  ;;  %v3852_v56 = vld [vmem:[#allocation2 + $0x3d0] sm:$0xff]  }
 0x122   :  { %3488 = vmatpush3.bf16.msra.mxu1 %v3798_v57  ;;  %3467 = vmatprep.subr.bf16.mxu0 %v3799_v58  ;;  %v3853_v57 = vld [vmem:[#allocation2 + $0x310] sm:$0xff]  }
 0x123   :  { %3489 = vmatprep.subr.bf16.mxu1 %v3800_v59  ;;  %v3854_v58 = vld [vmem:[#allocation2 + $0x390] sm:$0xff]   ;;  %v3855_v59 = vld [vmem:[#allocation2 + $0x358] sm:$0xff]  }
 0x125   :  { %3468 = vmatpush3.bf16.msra.mxu0 %v3801_v60  ;;  %v3856_v60 = vld [vmem:[#allocation2 + $0x3d8] sm:$0xff]  }
 0x126   :  { %3490 = vmatpush3.bf16.msra.mxu1 %v3802_v61  ;;  %3469 = vmatprep.subr.bf16.mxu0 %v3803_v62  ;;  %v3857_v61 = vld [vmem:[#allocation2 + $0x318] sm:$0xff]  }
 0x127   :  { %3491 = vmatprep.subr.bf16.mxu1 %v3804_v63  ;;  %v3858_v62 = vld [vmem:[#allocation2 + $0x398] sm:$0xff]   ;;  %v3859_v63 = vld [vmem:[#allocation2 + $0x360] sm:$0xff]  }
 0x129   :  { %3470 = vmatpush3.bf16.msra.mxu0 %v3805_v0  ;;  %v3860_v0 = vld [vmem:[#allocation2 + $0x3e0] sm:$0xff]  }
 0x12a   :  { %3492 = vmatpush3.bf16.msra.mxu1 %v3806_v1  ;;  %3471 = vmatprep.subr.bf16.mxu0 %v3807_v2  ;;  %v3861_v1 = vld [vmem:[#allocation2 + $0x320] sm:$0xff]  }
 0x12b   :  { %3493 = vmatprep.subr.bf16.mxu1 %v3808_v3  ;;  %v3862_v2 = vld [vmem:[#allocation2 + $0x3a0] sm:$0xff]   ;;  %v3863_v3 = vld [vmem:[#allocation2 + $0x368] sm:$0xff]  }
 0x12d   :  { %3472 = vmatpush3.bf16.msra.mxu0 %v3809_v4  ;;  %v3864_v4 = vld [vmem:[#allocation2 + $0x3e8] sm:$0xff]  }
 0x12e   :  { %3494 = vmatpush3.bf16.msra.mxu1 %v3810_v5  ;;  %3501 = vmatprep.subr.bf16.mxu0 %v3811_v6  ;;  %v3865_v5 = vld [vmem:[#allocation2 + $0x328] sm:$0xff]  }
 0x12f   :  { %3523 = vmatprep.subr.bf16.mxu1 %v3812_v7  ;;  %v3866_v6 = vld [vmem:[#allocation2 + $0x3a8] sm:$0xff]   ;;  %v3867_v7 = vld [vmem:[#allocation2 + $0x370] sm:$0xff]  }
 0x130   :  { %3148 = vmatmul.mubr.msk.bf16.vlgmr.msra.gmra.mrb[16].mxu0 %vm4206_vm2, %v3987_v50 }
 0x131   :  { %3152 = vmatmul.mubr.msk.bf16.vlgmr.msra.gmra.mrb[16].mxu1 %vm4210_vm3, %v3987_v50  ;;  %3502 = vmatpush3.bf16.msra.mxu0 %v3813_v9  ;;  %v3869_v9 = vld [vmem:[#allocation2 + $0x330] sm:$0xff]  }
 0x132   :  { %3186 = vmatprep.mubr.msk.bf16.mxu0 %vm4181_vm12, %v3987_v50  ;;  %3524 = vmatpush3.bf16.msra.mxu1 %v3814_v11  ;;  %v3871_v11 = vld [vmem:[#allocation2 + $0x378] sm:$0xff]   ;;  %vm2201_vm12 = vcmp.eq.s32.totalorder %v4062_v45, %v4226_v42  ;;  %v3900_v42 = vld [vmem:[#allocation5 + $0x3f0] sm:$0xff]  }
 0x133   :  { %3190 = vmatprep.mubr.msk.bf16.mxu1 %vm4188_vm13, %v3987_v50  ;;  %3503 = vmatprep.subr.bf16.mxu0 %v3815_v12  ;;  %v3872_v12 = vld [vmem:[#allocation2 + $0x3f8] sm:$0xff]   ;;  %vm2205_vm13 = vcmp.eq.s32.totalorder %v4062_v45, %v4228_v46  ;;  %v3880_v45 = vld [vmem:[#allocation5 + $0x3c8] sm:$0xff]  }
 0x134   :  { %3525 = vmatprep.subr.bf16.mxu1 %v3816_v13  ;;  %v3873_v13 = vld [vmem:[#allocation2 + $0x338] sm:$0xff]   ;;  %vm4270_vm15 = vmpackc.low %vm2205_vm13, %vm2201_vm12 }
 0x135   :  { %3504 = vmatpush3.bf16.msra.mxu0 %v3817_v14  ;;  %v3874_v14 = vld [vmem:[#allocation2 + $0x3b8] sm:$0xff]  }
 0x136   :  { %3526 = vmatpush3.bf16.msra.mxu1 %v3818_v15  ;;  %3505 = vmatprep.subr.bf16.mxu0 %v3819_v16  ;;  %v3875_v15 = vld [vmem:[#allocation5 + $0x340] sm:$0xff]  }
 0x137   :  { %3527 = vmatprep.subr.bf16.mxu1 %v3820_v17  ;;  %v3876_v16 = vld [vmem:[#allocation5 + $0x3c0] sm:$0xff]  }
 0x139   :  { %3506 = vmatpush3.bf16.msra.mxu0 %v3821_v18  ;;  %v3877_v18 = vld [vmem:[#allocation5 + $0x300] sm:$0xff]  }
 0x13a   :  { %3528 = vmatpush3.bf16.msra.mxu1 %v3822_v19  ;;  %3507 = vmatprep.subr.bf16.mxu0 %v3823_v20  ;;  %v3879_v20 = vld [vmem:[#allocation5 + $0x348] sm:$0xff]  }
 0x13b   :  { %3529 = vmatprep.subr.bf16.mxu1 %v3824_v21  ;;  %v3881_v21 = vld [vmem:[#allocation5 + $0x308] sm:$0xff]  }
 0x13d   :  { %3508 = vmatpush3.bf16.msra.mxu0 %v3825_v22  ;;  %v3882_v22 = vld [vmem:[#allocation5 + $0x388] sm:$0xff]  }
 0x13e   :  { %3530 = vmatpush3.bf16.msra.mxu1 %v3826_v23  ;;  %3509 = vmatprep.subr.bf16.mxu0 %v3827_v24  ;;  %v3883_v23 = vld [vmem:[#allocation5 + $0x350] sm:$0xff]  }
 0x13f   :  { %3531 = vmatprep.subr.bf16.mxu1 %v3828_v25  ;;  %v3884_v24 = vld [vmem:[#allocation5 + $0x3d0] sm:$0xff]  }
 0x140   :  { %v3885_v25 = vld [vmem:[#allocation5 + $0x310] sm:$0xff]  }
 0x141   :  { %3510 = vmatpush3.bf16.msra.mxu0 %v3829_v26  ;;  %v3886_v26 = vld [vmem:[#allocation5 + $0x390] sm:$0xff]  }
 0x142   :  { %3532 = vmatpush3.bf16.msra.mxu1 %v3830_v27  ;;  %3511 = vmatprep.subr.bf16.mxu0 %v3831_v28  ;;  %v3887_v27 = vld [vmem:[#allocation5 + $0x358] sm:$0xff]  }
 0x143   :  { %3533 = vmatprep.subr.bf16.mxu1 %v3832_v29  ;;  %v3888_v28 = vld [vmem:[#allocation5 + $0x3d8] sm:$0xff]  }
 0x144   :  { %v3889_v29 = vld [vmem:[#allocation5 + $0x318] sm:$0xff]  }
 0x145   :  { %3512 = vmatpush3.bf16.msra.mxu0 %v3833_v30  ;;  %v3890_v30 = vld [vmem:[#allocation5 + $0x398] sm:$0xff]  }
 0x146   :  { %3534 = vmatpush3.bf16.msra.mxu1 %v3834_v31  ;;  %3513 = vmatprep.subr.bf16.mxu0 %v3835_v32  ;;  %v3891_v31 = vld [vmem:[#allocation5 + $0x360] sm:$0xff]  }
 0x147   :  { %3535 = vmatprep.subr.bf16.mxu1 %v3836_v33  ;;  %v3892_v32 = vld [vmem:[#allocation5 + $0x3e0] sm:$0xff]  }
 0x148   :  { %v3893_v33 = vld [vmem:[#allocation5 + $0x320] sm:$0xff]  }
 0x149   :  { %3514 = vmatpush3.bf16.msra.mxu0 %v3837_v34  ;;  %v3894_v34 = vld [vmem:[#allocation5 + $0x3a0] sm:$0xff]  }
 0x14a   :  { %3536 = vmatpush3.bf16.msra.mxu1 %v3838_v35  ;;  %3515 = vmatprep.subr.bf16.mxu0 %v3839_v36  ;;  %v3895_v35 = vld [vmem:[#allocation5 + $0x368] sm:$0xff]  }
 0x14b   :  { %3537 = vmatprep.subr.bf16.mxu1 %v3840_v37  ;;  %v3896_v36 = vld [vmem:[#allocation5 + $0x3e8] sm:$0xff]  }
 0x14c   :  { %v3897_v37 = vld [vmem:[#allocation5 + $0x328] sm:$0xff]  }
 0x14d   :  { %3516 = vmatpush3.bf16.msra.mxu0 %v3841_v38  ;;  %v3898_v38 = vld [vmem:[#allocation5 + $0x3a8] sm:$0xff]  }
 0x14e   :  { %3538 = vmatpush3.bf16.msra.mxu1 %v3842_v39  ;;  %3545 = vmatprep.subr.bf16.mxu0 %v3843_v40  ;;  %v3899_v39 = vld [vmem:[#allocation5 + $0x370] sm:$0xff]  }
 0x14f   :  { %3567 = vmatprep.subr.bf16.mxu1 %v3844_v47 }
 0x150   :  { %3188 = vmatmul.mubr.msk.bf16.vlgmr.msra.gmra.mrb[20].mxu0 %vm4206_vm2, %v3987_v50 }
 0x151   :  { %3192 = vmatmul.mubr.msk.bf16.vlgmr.msra.gmra.mrb[20].mxu1 %vm4210_vm3, %v3987_v50  ;;  %3546 = vmatpush3.bf16.msra.mxu0 %v3845_v48 }
 0x152   :  { %3568 = vmatpush3.bf16.msra.mxu1 %v3846_v49  ;;  %3547 = vmatprep.subr.bf16.mxu0 %v3847_v51 }
 0x153   :  { %3569 = vmatprep.subr.bf16.mxu1 %v3848_v52  ;;  %3234 = vmatprep.mubr.msk.bf16.mxu0 %vm4241_vm8, %v3987_v50  ;;  %v3901_v52 = vld [vmem:[#allocation5 + $0x330] sm:$0xff]  }
 0x154   :  { %3238 = vmatprep.mubr.msk.bf16.mxu1 %vm4248_vm9, %v3987_v50 }
 0x155   :  { %3548 = vmatpush3.bf16.msra.mxu0 %v3849_v43 }
 0x156   :  { %3570 = vmatpush3.bf16.msra.mxu1 %v3850_v44  ;;  %3549 = vmatprep.subr.bf16.mxu0 %v3851_v55  ;;  %v3902_v44 = vld [vmem:[#allocation5 + $0x3b0] sm:$0xff]   ;;  %v3903_v55 = vld [vmem:[#allocation5 + $0x378] sm:$0xff]  }
 0x157   :  { %3571 = vmatprep.subr.bf16.mxu1 %v3852_v56 }
 0x159   :  { %3550 = vmatpush3.bf16.msra.mxu0 %v3853_v57 }
 0x15a   :  { %3572 = vmatpush3.bf16.msra.mxu1 %v3854_v58  ;;  %3551 = vmatprep.subr.bf16.mxu0 %v3855_v59  ;;  %v3904_v58 = vld [vmem:[#allocation5 + $0x3f8] sm:$0xff]  }
 0x15b   :  { %3573 = vmatprep.subr.bf16.mxu1 %v3856_v60 }
 0x15d   :  { %3552 = vmatpush3.bf16.msra.mxu0 %v3857_v61  ;;  %v3905_v61 = vld [vmem:[#allocation5 + $0x338] sm:$0xff]  }
 0x15e   :  { %3574 = vmatpush3.bf16.msra.mxu1 %v3858_v62  ;;  %3553 = vmatprep.subr.bf16.mxu0 %v3859_v63  ;;  %v3906_v63 = vld [vmem:[#allocation5 + $0x3b8] sm:$0xff]  }
 0x15f   :  { %3575 = vmatprep.subr.bf16.mxu1 %v3860_v0 }
 0x161   :  { %3554 = vmatpush3.bf16.msra.mxu0 %v3861_v1 }
 0x162   :  { %3576 = vmatpush3.bf16.msra.mxu1 %v3862_v2  ;;  %3555 = vmatprep.subr.bf16.mxu0 %v3863_v3 }
 0x163   :  { %3577 = vmatprep.subr.bf16.mxu1 %v3864_v4 }
 0x165   :  { %3556 = vmatpush3.bf16.msra.mxu0 %v3865_v5 }
 0x166   :  { %3578 = vmatpush3.bf16.msra.mxu1 %v3866_v6  ;;  %3557 = vmatprep.subr.bf16.mxu0 %v3867_v7 }
 0x167   :  { %3579 = vmatprep.subr.bf16.mxu1 %v3868_v8 }
 0x169   :  { %3558 = vmatpush3.bf16.msra.mxu0 %v3869_v9 }
 0x16a   :  { %3580 = vmatpush3.bf16.msra.mxu1 %v3870_v10  ;;  %3559 = vmatprep.subr.bf16.mxu0 %v3871_v11 }
 0x16b   :  { %3581 = vmatprep.subr.bf16.mxu1 %v3872_v12 }
 0x16d   :  { %3560 = vmatpush3.bf16.msra.mxu0 %v3873_v13 }
 0x16e   :  { %3582 = vmatpush3.bf16.msra.mxu1 %v3874_v14  ;;  %3589 = vmatprep.subr.bf16.mxu0 %v3875_v15 }
 0x16f   :  { %3611 = vmatprep.subr.bf16.mxu1 %v3876_v16 }
 0x170   :  { %3236 = vmatmul.mubr.msk.bf16.vlgmr.msra.gmra.mrb[24].mxu0 %vm4266_vm14, %v3987_v50 }
 0x171   :  { %3240 = vmatmul.mubr.msk.bf16.vlgmr.msra.gmra.mrb[24].mxu1 %vm4270_vm15, %v3987_v50  ;;  %3590 = vmatpush3.bf16.msra.mxu0 %v3877_v18 }
 0x172   :  { %3274 = vmatprep.mubr.msk.bf16.mxu0 %vm4241_vm8, %v3987_v50  ;;  %3612 = vmatpush3.bf16.msra.mxu1 %v3878_v41 }
 0x173   :  { %3278 = vmatprep.mubr.msk.bf16.mxu1 %vm4248_vm9, %v3987_v50  ;;  %3591 = vmatprep.subr.bf16.mxu0 %v3879_v20 }
 0x174   :  { %3613 = vmatprep.subr.bf16.mxu1 %v3880_v45 }
 0x175   :  { %3592 = vmatpush3.bf16.msra.mxu0 %v3881_v21 }
 0x176   :  { %3614 = vmatpush3.bf16.msra.mxu1 %v3882_v22  ;;  %3593 = vmatprep.subr.bf16.mxu0 %v3883_v23 }
 0x177   :  { %3615 = vmatprep.subr.bf16.mxu1 %v3884_v24 }
 0x179   :  { %3594 = vmatpush3.bf16.msra.mxu0 %v3885_v25 }
 0x17a   :  { %3616 = vmatpush3.bf16.msra.mxu1 %v3886_v26  ;;  %3595 = vmatprep.subr.bf16.mxu0 %v3887_v27 }
 0x17b   :  { %3617 = vmatprep.subr.bf16.mxu1 %v3888_v28 }
 0x17d   :  { %3596 = vmatpush3.bf16.msra.mxu0 %v3889_v29 }
 0x17e   :  { %3618 = vmatpush3.bf16.msra.mxu1 %v3890_v30  ;;  %3597 = vmatprep.subr.bf16.mxu0 %v3891_v31 }
 0x17f   :  { %3619 = vmatprep.subr.bf16.mxu1 %v3892_v32 }
 0x181   :  { %3598 = vmatpush3.bf16.msra.mxu0 %v3893_v33 }
 0x182   :  { %3620 = vmatpush3.bf16.msra.mxu1 %v3894_v34  ;;  %3599 = vmatprep.subr.bf16.mxu0 %v3895_v35 }
 0x183   :  { %v3297_v40 = vpop.f32.mrb[0].mxu0  ;;  %3621 = vmatprep.subr.bf16.mxu1 %v3896_v36 }
 0x184   :  { %v3319_v46 = vpop.f32.mrb[0].mxu1  ;;  %v3298_v47 = vpop.f32.mrb[1].mxu0 }
 0x185   :  { %v3299_v48 = vadd.f32 %v3298_v47, %v3297_v40  ;;  %v3320_v49 = vpop.f32.mrb[1].mxu1  ;;  %3600 = vmatpush3.bf16.msra.mxu0 %v3897_v37  ;;  %v3300_v51 = vpop.f32.mrb[2].mxu0 }
 0x186   :  { %v3321_v53 = vadd.f32 %v3320_v49, %v3319_v46  ;;  %3622 = vmatpush3.bf16.msra.mxu1 %v3898_v38  ;;  %v3322_v43 = vpop.f32.mrb[2].mxu1  ;;  %v3301_v54 = vpop.f32.mrb[3].mxu0  ;;  %3601 = vmatprep.subr.bf16.mxu0 %v3899_v39 }
 0x187   :  { %v3302_v56 = vadd.f32 %v3301_v54, %v3300_v51  ;;  %v3323_v57 = vpop.f32.mrb[3].mxu1  ;;  %3623 = vmatprep.subr.bf16.mxu1 %v3900_v42 }
 0x188   :  { %v481_v59 = vadd.f32 %v3321_v53, %v3299_v48  ;;  %v3324_v60 = vadd.f32 %v3323_v57, %v3322_v43 }
 0x189   :  { %3602 = vmatpush3.bf16.msra.mxu0 %v3901_v52 }
 0x18a   :  { %v484_v62 = vadd.f32 %v3324_v60, %v3302_v56  ;;  %3624 = vmatpush3.bf16.msra.mxu1 %v3902_v44  ;;  %3603 = vmatprep.subr.bf16.mxu0 %v3903_v55 }
 0x18b   :  { %3625 = vmatprep.subr.bf16.mxu1 %v3904_v58 }
 0x18d   :  { %3604 = vmatpush3.bf16.msra.mxu0 %v3905_v61 }
 0x18e   :  { %3626 = vmatpush3.bf16.msra.mxu1 %v3906_v63 }
 0x190   :  { %3276 = vmatmul.mubr.msk.bf16.vlgmr.msra.gmra.mrb[28].mxu0 %vm4266_vm14, %v3987_v50 }
 0x191   :  { %3280 = vmatmul.mubr.msk.bf16.vlgmr.msra.gmra.mrb[28].mxu1 %vm4270_vm15, %v3987_v50 }
 0x1a3   :  { %v3341_v0 = vpop.f32.mrb[4].mxu0 }
 0x1a4   :  { %v3363_v1 = vpop.f32.mrb[4].mxu1  ;;  %v3342_v2 = vpop.f32.mrb[5].mxu0 }
 0x1a5   :  { %v3343_v3 = vadd.f32 %v3342_v2, %v3341_v0  ;;  %v3364_v4 = vpop.f32.mrb[5].mxu1  ;;  %v3344_v5 = vpop.f32.mrb[6].mxu0 }
 0x1a6   :  { %v3365_v6 = vadd.f32 %v3364_v4, %v3363_v1  ;;  %v3366_v7 = vpop.f32.mrb[6].mxu1  ;;  %v3345_v8 = vpop.f32.mrb[7].mxu0 }
 0x1a7   :  { %v714_v9 = vadd.f32 %v3343_v3, %v481_v59  ;;  %v3346_v10 = vadd.f32 %v3345_v8, %v3344_v5  ;;  %v3367_v11 = vpop.f32.mrb[7].mxu1 }
 0x1a8   :  { %v3368_v12 = vadd.f32 %v3367_v11, %v3366_v7 }
 0x1a9   :  { %v755_v13 = vadd.f32 %v3365_v6, %v714_v9  ;;  %v717_v14 = vadd.f32 %v3346_v10, %v484_v62 }
 0x1ab   :  { %v758_v15 = vadd.f32 %v3368_v12, %v717_v14 }
 0x1c3   :  { %v3385_v16 = vpop.f32.mrb[8].mxu0 }
 0x1c4   :  { %v3407_v17 = vpop.f32.mrb[8].mxu1  ;;  %v3386_v18 = vpop.f32.mrb[9].mxu0 }
 0x1c5   :  { %v3387_v50 = vadd.f32 %v3386_v18, %v3385_v16  ;;  %v3408_v19 = vpop.f32.mrb[9].mxu1  ;;  %v3388_v41 = vpop.f32.mrb[10].mxu0 }
 0x1c6   :  { %v3409_v20 = vadd.f32 %v3408_v19, %v3407_v17  ;;  %v3410_v45 = vpop.f32.mrb[10].mxu1  ;;  %v3389_v21 = vpop.f32.mrb[11].mxu0 }
 0x1c7   :  { %v3390_v22 = vadd.f32 %v3389_v21, %v3388_v41  ;;  %v3411_v23 = vpop.f32.mrb[11].mxu1 }
 0x1c8   :  { %v1128_v24 = vadd.f32 %v3409_v20, %v3387_v50  ;;  %v3412_v25 = vadd.f32 %v3411_v23, %v3410_v45 }
 0x1ca   :  { %v1134_v26 = vadd.f32 %v1128_v24, %v755_v13  ;;  %v1131_v27 = vadd.f32 %v3412_v25, %v3390_v22 }
 0x1cc   :  { %v1135_v28 = vadd.f32 %v1131_v27, %v758_v15 }
 0x1e3   :  { %v3429_v29 = vpop.f32.mrb[12].mxu0 }
 0x1e4   :  { %v3451_v30 = vpop.f32.mrb[12].mxu1  ;;  %v3430_v31 = vpop.f32.mrb[13].mxu0 }
 0x1e5   :  { %v3431_v32 = vadd.f32 %v3430_v31, %v3429_v29  ;;  %v3452_v33 = vpop.f32.mrb[13].mxu1  ;;  %v3432_v34 = vpop.f32.mrb[14].mxu0 }
 0x1e6   :  { %v3453_v35 = vadd.f32 %v3452_v33, %v3451_v30  ;;  %v3454_v36 = vpop.f32.mrb[14].mxu1  ;;  %v3433_v37 = vpop.f32.mrb[15].mxu0 }
 0x1e7   :  { %v3434_v38 = vadd.f32 %v3433_v37, %v3432_v34  ;;  %v3455_v39 = vpop.f32.mrb[15].mxu1 }
 0x1e8   :  { %v1469_v40 = vadd.f32 %v3453_v35, %v3431_v32  ;;  %v3456_v42 = vadd.f32 %v3455_v39, %v3454_v36 }
 0x1ea   :  { %v1475_v46 = vadd.f32 %v1469_v40, %v1134_v26  ;;  %v1472_v47 = vadd.f32 %v3456_v42, %v3434_v38 }
 0x1ec   :  { %v1476_v48 = vadd.f32 %v1472_v47, %v1135_v28 }
 0x203   :  { %v3473_v49 = vpop.f32.mrb[16].mxu0 }
 0x204   :  { %v3495_v51 = vpop.f32.mrb[16].mxu1  ;;  %v3474_v52 = vpop.f32.mrb[17].mxu0 }
 0x205   :  { %v3475_v53 = vadd.f32 %v3474_v52, %v3473_v49  ;;  %v3496_v43 = vpop.f32.mrb[17].mxu1  ;;  %v3476_v54 = vpop.f32.mrb[18].mxu0 }
 0x206   :  { %v3497_v44 = vadd.f32 %v3496_v43, %v3495_v51  ;;  %v3498_v55 = vpop.f32.mrb[18].mxu1  ;;  %v3477_v56 = vpop.f32.mrb[19].mxu0 }
 0x207   :  { %v3478_v57 = vadd.f32 %v3477_v56, %v3476_v54  ;;  %v3499_v58 = vpop.f32.mrb[19].mxu1 }
 0x208   :  { %v1844_v59 = vadd.f32 %v3497_v44, %v3475_v53  ;;  %v3500_v60 = vadd.f32 %v3499_v58, %v3498_v55 }
 0x20a   :  { %v1850_v61 = vadd.f32 %v1844_v59, %v1475_v46  ;;  %v1847_v62 = vadd.f32 %v3500_v60, %v3478_v57 }
 0x20c   :  { %v1851_v63 = vadd.f32 %v1847_v62, %v1476_v48 }
 0x223   :  { %v3517_v0 = vpop.f32.mrb[20].mxu0 }
 0x224   :  { %v3539_v1 = vpop.f32.mrb[20].mxu1  ;;  %v3518_v2 = vpop.f32.mrb[21].mxu0 }
 0x225   :  { %v3519_v3 = vadd.f32 %v3518_v2, %v3517_v0  ;;  %v3540_v4 = vpop.f32.mrb[21].mxu1  ;;  %v3520_v5 = vpop.f32.mrb[22].mxu0 }
 0x226   :  { %v3541_v6 = vadd.f32 %v3540_v4, %v3539_v1  ;;  %v3542_v7 = vpop.f32.mrb[22].mxu1  ;;  %v3521_v8 = vpop.f32.mrb[23].mxu0 }
 0x227   :  { %v3522_v9 = vadd.f32 %v3521_v8, %v3520_v5  ;;  %v3543_v10 = vpop.f32.mrb[23].mxu1 }
 0x228   :  { %v2185_v11 = vadd.f32 %v3541_v6, %v3519_v3  ;;  %v3544_v12 = vadd.f32 %v3543_v10, %v3542_v7 }
 0x22a   :  { %v2191_v13 = vadd.f32 %v2185_v11, %v1850_v61  ;;  %v2188_v14 = vadd.f32 %v3544_v12, %v3522_v9 }
 0x22c   :  { %v2192_v15 = vadd.f32 %v2188_v14, %v1851_v63 }
 0x243   :  { %v3561_v16 = vpop.f32.mrb[24].mxu0 }
 0x244   :  { %v3583_v17 = vpop.f32.mrb[24].mxu1  ;;  %v3562_v18 = vpop.f32.mrb[25].mxu0 }
 0x245   :  { %v3563_v50 = vadd.f32 %v3562_v18, %v3561_v16  ;;  %v3584_v19 = vpop.f32.mrb[25].mxu1  ;;  %v3564_v41 = vpop.f32.mrb[26].mxu0 }
 0x246   :  { %v3585_v20 = vadd.f32 %v3584_v19, %v3583_v17  ;;  %v3586_v45 = vpop.f32.mrb[26].mxu1  ;;  %v3565_v21 = vpop.f32.mrb[27].mxu0 }
 0x247   :  { %v3566_v22 = vadd.f32 %v3565_v21, %v3564_v41  ;;  %v3587_v23 = vpop.f32.mrb[27].mxu1 }
 0x248   :  { %v2560_v24 = vadd.f32 %v3585_v20, %v3563_v50  ;;  %v3588_v25 = vadd.f32 %v3587_v23, %v3586_v45 }
 0x24a   :  { %v2566_v26 = vadd.f32 %v2560_v24, %v2191_v13  ;;  %v2563_v27 = vadd.f32 %v3588_v25, %v3566_v22 }
 0x24c   :  { %v2567_v28 = vadd.f32 %v2563_v27, %v2192_v15 }
 0x263   :  { %v3605_v29 = vpop.f32.mrb[28].mxu0 }
 0x264   :  { %v3627_v30 = vpop.f32.mrb[28].mxu1  ;;  %v3606_v31 = vpop.f32.mrb[29].mxu0 }
 0x265   :  { %v3607_v32 = vadd.f32 %v3606_v31, %v3605_v29  ;;  %v3628_v33 = vpop.f32.mrb[29].mxu1  ;;  %v3608_v34 = vpop.f32.mrb[30].mxu0 }
 0x266   :  { %v3629_v35 = vadd.f32 %v3628_v33, %v3627_v30  ;;  %v3630_v36 = vpop.f32.mrb[30].mxu1  ;;  %v3609_v37 = vpop.f32.mrb[31].mxu0 }
 0x267   :  { %v3610_v38 = vadd.f32 %v3609_v37, %v3608_v34  ;;  %v3631_v39 = vpop.f32.mrb[31].mxu1 }
 0x268   :  { %v2901_v40 = vadd.f32 %v3629_v35, %v3607_v32  ;;  %v3632_v42 = vadd.f32 %v3631_v39, %v3630_v36 }
 0x26a   :  { %v2907_v46 = vadd.f32 %v2901_v40, %v2566_v26  ;;  %v2904_v47 = vadd.f32 %v3632_v42, %v3610_v38 }
 0x26c   :  { %2909 = vst [vmem:[#allocation7] sm:$0xff] %v2907_v46  ;;  %v2908_v48 = vadd.f32 %v2904_v47, %v2567_v28 }
 0x26e   :  { %2910 = vst [vmem:[#allocation7 + $0x8] sm:$0xff] %v2908_v48 }
 0x26f   :  { %3962 = shalt.err (!%p3959_p6)
}
 0x270   :  { %s3963_s17 = scalar_lea.hbm %s4307_s3, 256 }
 0x271   :  { %p3964_p7 = scmp.ne.s32.totalorder %s4307_s3, %s3963_s17  ;;  %p3967_p8 = scmp.lt.u32.totalorder %s3963_s17, %s4307_s3 }
 0x273   :  { %p3969_p9 = pnand %p3967_p8, %p3964_p7 }
 0x275   :  { %3972 = shalt.err (!%p3969_p9)
}
 0x276   :  { %s3989_s22 = smov 128   ;;  %s3990_s23 = smov 8  }
 0x277   :  { %2922 = dma.vmem_to_hbm [thread:$0]  %s2917_s2, 256, %s4307_s3, [#allocation4], %s3989_s22, %s3989_s22, %s3990_s23  }
 0x278   :  { %3977 = dma.done.wait [#allocation4], 256  }
 0x279   :  { %3978 = vsyncadd [#allocation4], 4294967040 }
 0x27a   :  { %2926 = vsyncpa [#allocation3], 1 }
 0x27b   :  { %2927 = vsyncpa [#allocation6], 1 }
 0x27c   :  { %2928 = vsyncpa [#allocation4], 1 }

</bundles_post_ra>
